<compile_context>
chip_gen: v7x
topology: tpu7x:2x2x1
jax: 0.10.0
libtpu: 0.0.40
codegen_flags: <defaults>
</compile_context>

<pallas_src>
import jax
import jax.numpy as jnp
from jax.experimental import pallas as pl
from jax.experimental.pallas import tpu as pltpu


def relu_resblock_kernel(x_ref, w1_ref, b1_ref, w2_ref, b2_ref, o_ref):
    # x_ref       : (TB, NP)  batch tile of the (zero-padded) input
    # w1_ref/w2_ref: (NP, NP) weights already in (in, out) layout -> y = x @ W + b
    # b1_ref/b2_ref: (1, NP)  biases (zero in padded lanes)
    x = x_ref[...]
    # Linear 1 + ReLU
    h = jnp.dot(x, w1_ref[...], preferred_element_type=jnp.float32) + b1_ref[...]
    h = jnp.maximum(h, 0.0)
    # Linear 2 + ReLU
    y = jnp.dot(h, w2_ref[...], preferred_element_type=jnp.float32) + b2_ref[...]
    y = jnp.maximum(y, 0.0)
    # Residual add (pre-activation input)
    o_ref[...] = (y + x).astype(o_ref.dtype)


def relu_resblock(x, w1, b1, w2, b2, *, tb=None):
    """Fused RELUResBlock forward.

    x : (B, N) float32
    w1, w2 : (N, N) PyTorch-layout (out, in) weights
    b1, b2 : (N,) biases
    """
    B, N = x.shape

    # --- lane-dense feature padding (multiple of 128) ---------------------------
    NP = ((N + 127) // 128) * 128
    # --- batch tiling: big tiles, sublane-aligned --------------------------------
    if tb is None:
        tb = min(256, B)
    tb = ((tb + 7) // 8) * 8
    n_steps = pl.cdiv(B, tb)
    BP = n_steps * tb

    f32 = jnp.float32
    x_p = jnp.zeros((BP, NP), f32).at[:B, :N].set(x.astype(f32))
    # Pre-transpose to (in, out) so the kernel does x @ W with no in-kernel .T.
    w1_p = jnp.zeros((NP, NP), f32).at[:N, :N].set(w1.T.astype(f32))
    w2_p = jnp.zeros((NP, NP), f32).at[:N, :N].set(w2.T.astype(f32))
    b1_p = jnp.zeros((1, NP), f32).at[0, :N].set(b1.astype(f32))
    b2_p = jnp.zeros((1, NP), f32).at[0, :N].set(b2.astype(f32))

    flops = 2 * 2 * BP * NP * NP + 4 * BP * NP          # two matmuls + bias/relu/res
    bytes_accessed = 4 * (2 * BP * NP + 2 * NP * NP + 2 * NP)

    out_p = pl.pallas_call(
        relu_resblock_kernel,
        out_shape=jax.ShapeDtypeStruct((BP, NP), x.dtype),
        grid_spec=pltpu.PrefetchScalarGridSpec(
            num_scalar_prefetch=0,
            grid=(n_steps,),
            in_specs=[
                pl.BlockSpec((tb, NP), lambda i: (i, 0)),                 # x tile
                pl.BlockSpec((NP, NP), lambda i: (0, 0),
                             pipeline_mode=pl.Buffered(1)),               # W1 (resident)
                pl.BlockSpec((1, NP), lambda i: (0, 0),
                             pipeline_mode=pl.Buffered(1)),               # b1
                pl.BlockSpec((NP, NP), lambda i: (0, 0),
                             pipeline_mode=pl.Buffered(1)),               # W2 (resident)
                pl.BlockSpec((1, NP), lambda i: (0, 0),
                             pipeline_mode=pl.Buffered(1)),               # b2
            ],
            out_specs=pl.BlockSpec((tb, NP), lambda i: (i, 0)),
        ),
        compiler_params=pltpu.CompilerParams(
            dimension_semantics=("parallel",),
        ),
        cost_estimate=pl.CostEstimate(
            flops=flops, transcendentals=0, bytes_accessed=bytes_accessed),
    )(x_p, w1_p, b1_p, w2_p, b2_p)

    # Strip the zero padding.
    return out_p[:B, :N]


if __name__ == "__main__":
    # Deterministic parameter + input construction (dropout=0.0 -> no dropout layer).
    num_neurons = 32
    batch = 16
    key = jax.random.PRNGKey(0)
    kx, kw1, kb1, kw2, kb2 = jax.random.split(key, 5)

    # nn.Linear default-init-like bounds: U(-1/sqrt(N), 1/sqrt(N))
    bound = 1.0 / jnp.sqrt(num_neurons)
    x = jax.random.normal(kx, (batch, num_neurons), dtype=jnp.float32)
    w1 = jax.random.uniform(kw1, (num_neurons, num_neurons), jnp.float32, -bound, bound)
    b1 = jax.random.uniform(kb1, (num_neurons,), jnp.float32, -bound, bound)
    w2 = jax.random.uniform(kw2, (num_neurons, num_neurons), jnp.float32, -bound, bound)
    b2 = jax.random.uniform(kb2, (num_neurons,), jnp.float32, -bound, bound)

    out = relu_resblock(x, w1, b1, w2, b2)
    out = jax.block_until_ready(out)

    # Pure-JAX reference (same semantics as the PyTorch forward).
    h_ref = jnp.maximum(x @ w1.T + b1, 0.0)
    y_ref = jnp.maximum(h_ref @ w2.T + b2, 0.0) + x
    assert out.shape == y_ref.shape
    assert jnp.allclose(out, y_ref, atol=1e-5, rtol=1e-5)

    print("KERNEL_OK")
</pallas_src>

<mosaic_0001>
module attributes {stable_mosaic.version = 11 : i64} {
  func.func @relu_resblock_kernel(%arg0: i32, %arg1: memref<16x128xf32, #tpu.memory_space<vmem>>, %arg2: memref<128x128xf32, #tpu.memory_space<vmem>>, %arg3: memref<1x128xf32, #tpu.memory_space<vmem>>, %arg4: memref<128x128xf32, #tpu.memory_space<vmem>>, %arg5: memref<1x128xf32, #tpu.memory_space<vmem>>, %arg6: memref<16x128xf32, #tpu.memory_space<vmem>>) attributes {dimension_semantics = [#tpu.dimension_semantics<parallel>], iteration_bounds = array<i64: 1>, scalar_prefetch = 0 : i64, scratch_operands = 0 : i64, tpu.core_type = #tpu.core_type<tc>, window_params = [{transform_indices = @transform_0, window_bounds = array<i64: 16, 128>}, {pipeline_mode = #tpu.pipeline_mode<synchronous>, transform_indices = @transform_1, window_bounds = array<i64: 128, 128>}, {pipeline_mode = #tpu.pipeline_mode<synchronous>, transform_indices = @transform_2, window_bounds = array<i64: 1, 128>}, {pipeline_mode = #tpu.pipeline_mode<synchronous>, transform_indices = @transform_3, window_bounds = array<i64: 128, 128>}, {pipeline_mode = #tpu.pipeline_mode<synchronous>, transform_indices = @transform_4, window_bounds = array<i64: 1, 128>}, {transform_indices = @transform_5, window_bounds = array<i64: 16, 128>}]} {
    %c0 = arith.constant 0 : index
    %c0_0 = arith.constant 0 : index
    %0 = vector.load %arg1[%c0, %c0_0] : memref<16x128xf32, #tpu.memory_space<vmem>>, vector<16x128xf32>
    %c0_1 = arith.constant 0 : index
    %c0_2 = arith.constant 0 : index
    %1 = vector.load %arg2[%c0_1, %c0_2] : memref<128x128xf32, #tpu.memory_space<vmem>>, vector<128x128xf32>
    %cst = arith.constant dense<0.000000e+00> : vector<16x128xf32>
    %2 = tpu.matmul %0, %1, %cst {dimension_numbers = #tpu.dot_dimension_numbers<[1], [0], [0], [1], [0, 0, 1, 1], [], []>} : vector<16x128xf32>, vector<128x128xf32>, vector<16x128xf32> -> vector<16x128xf32>
    %c0_3 = arith.constant 0 : index
    %c0_4 = arith.constant 0 : index
    %3 = vector.load %arg3[%c0_3, %c0_4] : memref<1x128xf32, #tpu.memory_space<vmem>>, vector<1x128xf32>
    %4 = vector.broadcast %3 : vector<1x128xf32> to vector<16x128xf32>
    %5 = arith.addf %2, %4 : vector<16x128xf32>
    %cst_5 = arith.constant 0.000000e+00 : f32
    %6 = vector.broadcast %cst_5 : f32 to vector<16x128xf32>
    %7 = arith.maximumf %5, %6 : vector<16x128xf32>
    %c0_6 = arith.constant 0 : index
    %c0_7 = arith.constant 0 : index
    %8 = vector.load %arg4[%c0_6, %c0_7] : memref<128x128xf32, #tpu.memory_space<vmem>>, vector<128x128xf32>
    %cst_8 = arith.constant dense<0.000000e+00> : vector<16x128xf32>
    %9 = tpu.matmul %7, %8, %cst_8 {dimension_numbers = #tpu.dot_dimension_numbers<[1], [0], [0], [1], [0, 0, 1, 1], [], []>} : vector<16x128xf32>, vector<128x128xf32>, vector<16x128xf32> -> vector<16x128xf32>
    %c0_9 = arith.constant 0 : index
    %c0_10 = arith.constant 0 : index
    %10 = vector.load %arg5[%c0_9, %c0_10] : memref<1x128xf32, #tpu.memory_space<vmem>>, vector<1x128xf32>
    %11 = vector.broadcast %10 : vector<1x128xf32> to vector<16x128xf32>
    %12 = arith.addf %9, %11 : vector<16x128xf32>
    %cst_11 = arith.constant 0.000000e+00 : f32
    %13 = vector.broadcast %cst_11 : f32 to vector<16x128xf32>
    %14 = arith.maximumf %12, %13 : vector<16x128xf32>
    %15 = arith.addf %14, %0 : vector<16x128xf32>
    %c0_12 = arith.constant 0 : index
    %c0_13 = arith.constant 0 : index
    %16 = vector.load %arg6[%c0_12, %c0_13] : memref<16x128xf32, #tpu.memory_space<vmem>>, vector<16x128xf32>
    tpu.vector_store %arg6[%c0_12, %c0_13], %15 {strides = array<i32>} : memref<16x128xf32, #tpu.memory_space<vmem>>, vector<16x128xf32>,
    return
  }
  func.func @transform_0(%arg0: i32) -> (i32, i32) {
    %c0_i32 = arith.constant 0 : i32
    %c0_i32_0 = arith.constant 0 : i32
    return %arg0, %c0_i32 : i32, i32
  }
  func.func @transform_1(%arg0: i32) -> (i32, i32) {
    %c0_i32 = arith.constant 0 : i32
    %c0_i32_0 = arith.constant 0 : i32
    %c0_i32_1 = arith.constant 0 : i32
    return %c0_i32, %c0_i32_0 : i32, i32
  }
  func.func @transform_2(%arg0: i32) -> (i32, i32) {
    %c0_i32 = arith.constant 0 : i32
    %c0_i32_0 = arith.constant 0 : i32
    %c0_i32_1 = arith.constant 0 : i32
    return %c0_i32, %c0_i32_0 : i32, i32
  }
  func.func @transform_3(%arg0: i32) -> (i32, i32) {
    %c0_i32 = arith.constant 0 : i32
    %c0_i32_0 = arith.constant 0 : i32
    %c0_i32_1 = arith.constant 0 : i32
    return %c0_i32, %c0_i32_0 : i32, i32
  }
  func.func @transform_4(%arg0: i32) -> (i32, i32) {
    %c0_i32 = arith.constant 0 : i32
    %c0_i32_0 = arith.constant 0 : i32
    %c0_i32_1 = arith.constant 0 : i32
    return %c0_i32, %c0_i32_0 : i32, i32
  }
  func.func @transform_5(%arg0: i32) -> (i32, i32) {
    %c0_i32 = arith.constant 0 : i32
    %c0_i32_0 = arith.constant 0 : i32
    return %arg0, %c0_i32 : i32, i32
  }
}

</mosaic_0001>

<bundles_post_ra>
// kernel: tpu_custom_call.1
= control target key start
LH: loop header
LB: loop body
LE: loop exit
PB: predicated region body
PF: predicated region fallthrough
CT: control target
= control target key end

     0   :  { %10 = vsyncpa [#allocation3], 0  ;;  %s671_s0 = inlined_call_operand.hbm [shape: f32[16,128], index: 0, kind: input, shape index: {}]   ;;  %s672_s1 = inlined_call_operand.hbm [shape: f32[128,128], index: 1, kind: input, shape index: {}]   ;;  %s673_s2 = inlined_call_operand.vmem [shape: f32[1,128], index: 2, kind: input, shape index: {}]   ;;  %s674_s3 = inlined_call_operand.hbm [shape: f32[128,128], index: 3, kind: input, shape index: {}]   ;;  %s675_s4 = inlined_call_operand.vmem [shape: f32[1,128], index: 4, kind: input, shape index: {}]   ;;  %s676_s5 = inlined_call_operand.hbm [shape: f32[16,128], index: 5, kind: output, shape index: {}]  }
   0x1   :  { %11 = vsyncpa [#allocation6], 0 }
   0x2   :  { %12 = vsyncpa [#allocation4], 0  ;;  %s558_s18 = smov [#allocation5]   ;;  %s559_s20 = smov [#allocation2]  }
   0x3   :  { %s30_s19 = sshll.u32 %s558_s18, 4  ;;  %s18_s21 = sshll.u32 %s559_s20, 4  ;;  %s31_s19 = int_to_ptr.vmem [resolvable:$true] %s30_s19  ;;  %s594_s21 = int_to_ptr.vmem [resolvable:$true] %s18_s21 }
   0x4   :  { %s464_s24 = scalar_lea.hbm %s672_s1, 2048 }
   0x5   :  { %p465_p0 = scmp.ne.s32.totalorder %s672_s1, %s464_s24  ;;  %p468_p1 = scmp.lt.u32.totalorder %s464_s24, %s672_s1 }
   0x7   :  { %p470_p2 = pnand %p468_p1, %p465_p0 }
   0x9   :  { %473 = shalt.err (!%p470_p2)
}
   0xa   :  { %s474_s29 = scalar_lea.vmem %s31_s19, 2048  ;;  %p479_p4 = scmp.lt.s32.totalorder %s31_s19, %s31_s19 }
   0xb   :  { %p475_p3 = scmp.ne.s32.totalorder %s31_s19, %s474_s29  ;;  %p480_p5 = scmp.lt.s32.totalorder %s474_s29, %s474_s29 }
   0xd   :  { %p481_p6 = por %p480_p5, %p479_p4 }
   0xf   :  { %p482_p7 = pnand %p481_p6, %p475_p3 }
  0x11   :  { %485 = shalt.err (!%p482_p7)
}
  0x12   :  { %s560_s30 = smov 128   ;;  %s561_s6 = smov 8  }
  0x13   :  { %36 = dma.hbm_to_vmem [thread:$0]  %s672_s1, 2048, %s31_s19, [#allocation6], %s560_s30, %s560_s30, %s561_s6  }
  0x14   :  { %s486_s11 = scalar_lea.hbm %s671_s0, 256 }
  0x15   :  { %p487_p8 = scmp.ne.s32.totalorder %s671_s0, %s486_s11  ;;  %p490_p9 = scmp.lt.u32.totalorder %s486_s11, %s671_s0 }
  0x17   :  { %p492_p10 = pnand %p490_p9, %p487_p8 }
  0x19   :  { %495 = shalt.err (!%p492_p10)
}
  0x1a   :  { %s496_s16 = scalar_lea.vmem %s594_s21, 256  ;;  %p501_p12 = scmp.lt.s32.totalorder %s594_s21, %s594_s21 }
  0x1b   :  { %p497_p11 = scmp.ne.s32.totalorder %s594_s21, %s496_s16  ;;  %p502_p13 = scmp.lt.s32.totalorder %s496_s16, %s496_s16 }
  0x1d   :  { %p503_p0 = por %p502_p13, %p501_p12 }
  0x1f   :  { %p504_p1 = pnand %p503_p0, %p497_p11 }
  0x21   :  { %507 = shalt.err (!%p504_p1)
}
  0x22   :  { %24 = dma.hbm_to_vmem [thread:$0]  %s671_s0, 256, %s594_s21, [#allocation3], %s560_s30, %s560_s30, %s561_s6  }
  0x23   :  { %s562_s18 = smov [#allocation7]   ;;  %s508_s23 = scalar_lea.hbm %s674_s3, 2048 }
  0x24   :  { %s44_s19 = sshll.u32 %s562_s18, 4  ;;  %p509_p2 = scmp.ne.s32.totalorder %s674_s3, %s508_s23  ;;  %s45_s19 = int_to_ptr.vmem [resolvable:$true] %s44_s19 }
  0x25   :  { %p512_p3 = scmp.lt.u32.totalorder %s508_s23, %s674_s3 }
  0x27   :  { %p514_p4 = pnand %p512_p3, %p509_p2 }
  0x29   :  { %517 = shalt.err (!%p514_p4)
}
  0x2a   :  { %s518_s28 = scalar_lea.vmem %s45_s19, 2048  ;;  %p523_p6 = scmp.lt.s32.totalorder %s45_s19, %s45_s19 }
  0x2b   :  { %p519_p5 = scmp.ne.s32.totalorder %s45_s19, %s518_s28  ;;  %p524_p7 = scmp.lt.s32.totalorder %s518_s28, %s518_s28 }
  0x2d   :  { %p525_p8 = por %p524_p7, %p523_p6 }
  0x2f   :  { %p526_p9 = pnand %p525_p8, %p519_p5 }
  0x31   :  { %529 = shalt.err (!%p526_p9)
}
  0x32   :  { %50 = dma.hbm_to_vmem [thread:$0]  %s674_s3, 2048, %s45_s19, [#allocation6], %s560_s30, %s560_s30, %s561_s6  }
  0x33   :  { %552 = dma.done.wait [#allocation3], 256  }
  0x34   :  { %553 = vsyncadd [#allocation3], 4294967040 }
  0x35   :  { %554 = dma.done.wait [#allocation6], 4096  }
  0x36   :  { %555 = vsyncadd [#allocation6], 4294963200  ;;  %v64_v0 = vld [vmem:[#allocation5] sm:$0xff]  ;;  %v65_v1 = vld [vmem:[#allocation5 + $0x8] sm:$0xff]  ;;  %s563_s9 = smov [#allocation8]  }
  0x37   :  { %v66_v2 = vld [vmem:[#allocation5 + $0x10] sm:$0xff]  ;;  %v394_v3 = vpack.c.bf16 %v65_v1, %v64_v0  ;;  %v67_v4 = vld [vmem:[#allocation5 + $0x18] sm:$0xff]  ;;  %v68_v6 = vld [vmem:[#allocation5 + $0x20] sm:$0xff]  ;;  %s273_s10 = sshll.u32 %s563_s9, 4  ;;  %s274_s10 = int_to_ptr.vmem [resolvable:$true] %s273_s10 }
  0x38   :  { %v398_v5 = vpack.c.bf16 %v67_v4, %v66_v2  ;;  %v69_v7 = vld [vmem:[#allocation5 + $0x28] sm:$0xff]  ;;  %v70_v9 = vld [vmem:[#allocation5 + $0x30] sm:$0xff]  ;;  %v71_v10 = vld [vmem:[#allocation5 + $0x38] sm:$0xff]  ;;  %p535_p11 = scmp.lt.s32.totalorder %s274_s10, %s274_s10 }
  0x39   :  { %395 = vmatprep.subr.bf16.mxu0 %v394_v3  ;;  %v402_v8 = vpack.c.bf16 %v69_v7, %v68_v6  ;;  %v646_v11 = vld [vmem:[#allocation2] sm:$0xff]  ;;  %v164_v12 = vld [vmem:[#allocation7] sm:$0xff]  ;;  %v165_v13 = vld [vmem:[#allocation7 + $0x8] sm:$0xff]  ;;  %v406_v20 = vpack.c.bf16 %v71_v10, %v70_v9 }
  0x3a   :  { %397 = vmatpush3.bf16.msra.mxu0 %v394_v3  ;;  %356 = vmatprep.mubr.f32.mxu0 %v646_v11  ;;  %v166_v14 = vld [vmem:[#allocation7 + $0x10] sm:$0xff]  ;;  %v426_v15 = vpack.c.bf16 %v165_v13, %v164_v12  ;;  %v167_v16 = vld [vmem:[#allocation7 + $0x18] sm:$0xff]  ;;  %v168_v18 = vld [vmem:[#allocation7 + $0x20] sm:$0xff] }
  0x3b   :  { %399 = vmatprep.subr.bf16.mxu0 %v398_v5  ;;  %v430_v17 = vpack.c.bf16 %v167_v16, %v166_v14  ;;  %v169_v19 = vld [vmem:[#allocation7 + $0x28] sm:$0xff]  ;;  %v72_v21 = vld [vmem:[#allocation5 + $0x40] sm:$0xff]  ;;  %v170_v24 = vld [vmem:[#allocation7 + $0x30] sm:$0xff] }
  0x3c   :  { %427 = vmatprep.subr.bf16.mxu1 %v426_v15  ;;  %v73_v22 = vld [vmem:[#allocation5 + $0x48] sm:$0xff]  ;;  %v434_v23 = vpack.c.bf16 %v169_v19, %v168_v18  ;;  %v171_v25 = vld [vmem:[#allocation7 + $0x38] sm:$0xff]  ;;  %v74_v27 = vld [vmem:[#allocation5 + $0x50] sm:$0xff] }
  0x3d   :  { %429 = vmatpush3.bf16.msra.mxu1 %v426_v15  ;;  %v410_v26 = vpack.c.bf16 %v73_v22, %v72_v21  ;;  %v75_v28 = vld [vmem:[#allocation5 + $0x58] sm:$0xff]  ;;  %v438_v29 = vpack.c.bf16 %v171_v25, %v170_v24  ;;  %v172_v30 = vld [vmem:[#allocation7 + $0x40] sm:$0xff]  ;;  %v173_v31 = vld [vmem:[#allocation7 + $0x48] sm:$0xff] }
  0x3e   :  { %401 = vmatpush3.bf16.msra.mxu0 %v398_v5  ;;  %431 = vmatprep.subr.bf16.mxu1 %v430_v17  ;;  %v414_v32 = vpack.c.bf16 %v75_v28, %v74_v27  ;;  %v76_v33 = vld [vmem:[#allocation5 + $0x60] sm:$0xff]  ;;  %v77_v34 = vld [vmem:[#allocation5 + $0x68] sm:$0xff]  ;;  %v442_v35 = vpack.c.bf16 %v173_v31, %v172_v30  ;;  %v174_v36 = vld [vmem:[#allocation7 + $0x50] sm:$0xff] }
  0x3f   :  { %403 = vmatprep.subr.bf16.mxu0 %v402_v8  ;;  %v175_v37 = vld [vmem:[#allocation7 + $0x58] sm:$0xff]  ;;  %v418_v38 = vpack.c.bf16 %v77_v34, %v76_v33  ;;  %v78_v39 = vld [vmem:[#allocation5 + $0x70] sm:$0xff]  ;;  %v176_v42 = vld [vmem:[#allocation7 + $0x60] sm:$0xff] }
  0x40   :  { %v79_v40 = vld [vmem:[#allocation5 + $0x78] sm:$0xff]  ;;  %v446_v41 = vpack.c.bf16 %v175_v37, %v174_v36  ;;  %v177_v43 = vld [vmem:[#allocation7 + $0x68] sm:$0xff]  ;;  %v178_v47 = vld [vmem:[#allocation7 + $0x70] sm:$0xff] }
  0x41   :  { %433 = vmatpush3.bf16.msra.mxu1 %v430_v17  ;;  %v422_v44 = vpack.c.bf16 %v79_v40, %v78_v39  ;;  %v450_v45 = vpack.c.bf16 %v177_v43, %v176_v42  ;;  %v63_v46 = vld [vmem:[#allocation2 + $0x8] sm:$0xff]  ;;  %v286_v50 = vld [vmem:[%s673_s2] ss:$0 sm:$0xff]  ;;  %s530_s2 = scalar_lea.vmem %s274_s10, 256 }
  0x42   :  { %405 = vmatpush3.bf16.msra.mxu0 %v402_v8  ;;  %435 = vmatprep.subr.bf16.mxu1 %v434_v23  ;;  %v179_v48 = vld [vmem:[#allocation7 + $0x78] sm:$0xff]  ;;  %v287_v57 = vld [vmem:[%s675_s4] ss:$0 sm:$0xff]  ;;  %p531_p10 = scmp.ne.s32.totalorder %s274_s10, %s530_s2  ;;  %p536_p12 = scmp.lt.s32.totalorder %s530_s2, %s530_s2 }
  0x43   :  { %407 = vmatprep.subr.bf16.mxu0 %v406_v20  ;;  %v454_v49 = vpack.c.bf16 %v179_v48, %v178_v47 }
  0x44   :  { %p537_p13 = por %p536_p12, %p535_p11 }
  0x45   :  { %437 = vmatpush3.bf16.msra.mxu1 %v434_v23 }
  0x46   :  { %409 = vmatpush3.bf16.msra.mxu0 %v406_v20  ;;  %439 = vmatprep.subr.bf16.mxu1 %v438_v29  ;;  %p538_p0 = pnand %p537_p13, %p531_p10 }
  0x47   :  { %411 = vmatprep.subr.bf16.mxu0 %v410_v26 }
  0x49   :  { %441 = vmatpush3.bf16.msra.mxu1 %v438_v29 }
  0x4a   :  { %413 = vmatpush3.bf16.msra.mxu0 %v410_v26  ;;  %443 = vmatprep.subr.bf16.mxu1 %v442_v35 }
  0x4b   :  { %415 = vmatprep.subr.bf16.mxu0 %v414_v32 }
  0x4d   :  { %445 = vmatpush3.bf16.msra.mxu1 %v442_v35 }
  0x4e   :  { %417 = vmatpush3.bf16.msra.mxu0 %v414_v32  ;;  %447 = vmatprep.subr.bf16.mxu1 %v446_v41 }
  0x4f   :  { %419 = vmatprep.subr.bf16.mxu0 %v418_v38 }
  0x51   :  { %449 = vmatpush3.bf16.msra.mxu1 %v446_v41 }
  0x52   :  { %421 = vmatpush3.bf16.msra.mxu0 %v418_v38  ;;  %451 = vmatprep.subr.bf16.mxu1 %v450_v45 }
  0x53   :  { %423 = vmatprep.subr.bf16.mxu0 %v422_v44 }
  0x55   :  { %453 = vmatpush3.bf16.msra.mxu1 %v450_v45 }
  0x56   :  { %425 = vmatpush3.bf16.msra.mxu0 %v422_v44  ;;  %455 = vmatprep.subr.bf16.mxu1 %v454_v49 }
  0x59   :  { %357 = vmatmul.mubr.f32.vlgmr.msra.gmra.mrb[0].mxu0 %v63_v46  ;;  %457 = vmatpush3.bf16.msra.mxu1 %v454_v49 }
 0x12c   :  { %v358_v51 = vpop.f32.mrb[0].mxu0 }
 0x12d   :  { %v159_v52 = vadd.f32 %v358_v51, %v286_v50  ;;  %v153_v53 = vpop.f32.mrb[1].mxu0 }
 0x12e   :  { %v154_v54 = vadd.f32 %v286_v50, %v153_v53 }
 0x12f   :  { %v163_v56 = vmax.f32 %v159_v52, 0.0 }
 0x130   :  { %v162_v55 = vmax.f32 %v154_v54, 0.0 }
 0x132   :  { %391 = vmatprep.mubr.f32.mxu1 %v162_v55 }
 0x133   :  { %392 = vmatmul.mubr.f32.vlgmr.msra.gmra.mrb[0].mxu1 %v163_v56 }
 0x206   :  { %v393_v58 = vpop.f32.mrb[0].mxu1 }
 0x207   :  { %v259_v59 = vadd.f32 %v393_v58, %v287_v57  ;;  %v253_v60 = vpop.f32.mrb[1].mxu1 }
 0x208   :  { %v254_v61 = vadd.f32 %v287_v57, %v253_v60 }
 0x209   :  { %v263_v62 = vmax.f32 %v259_v59, 0.0 }
 0x20a   :  { %v262_v63 = vmax.f32 %v254_v61, 0.0 }
 0x20b   :  { %v265_v0 = vadd.f32 %v263_v62, %v63_v46 }
 0x20c   :  { %v264_v1 = vadd.f32 %v262_v63, %v646_v11 }
 0x20d   :  { %267 = vst [vmem:[#allocation8 + $0x8] sm:$0xff] %v265_v0 }
 0x20e   :  { %266 = vst [vmem:[#allocation8] sm:$0xff] %v264_v1 }
 0x20f   :  { %541 = shalt.err (!%p538_p0)
}
 0x210   :  { %s542_s12 = scalar_lea.hbm %s676_s5, 256 }
 0x211   :  { %p543_p1 = scmp.ne.s32.totalorder %s676_s5, %s542_s12  ;;  %p546_p2 = scmp.lt.u32.totalorder %s542_s12, %s676_s5 }
 0x213   :  { %p548_p3 = pnand %p546_p2, %p543_p1 }
 0x215   :  { %551 = shalt.err (!%p548_p3)
}
 0x216   :  { %279 = dma.vmem_to_hbm [thread:$0]  %s274_s10, 256, %s676_s5, [#allocation4], %s560_s30, %s560_s30, %s561_s6  }
 0x217   :  { %556 = dma.done.wait [#allocation4], 256  }
 0x218   :  { %557 = vsyncadd [#allocation4], 4294967040 }
 0x219   :  { %283 = vsyncpa [#allocation3], 1 }
 0x21a   :  { %284 = vsyncpa [#allocation6], 1 }
 0x21b   :  { %285 = vsyncpa [#allocation4], 1 }

</bundles_post_ra>
